<compile_context>
chip_gen: v7x
topology: tpu7x:2x2x1
jax: 0.10.0
libtpu: 0.0.40
codegen_flags: <defaults>
</compile_context>

<pallas_src>
import functools

import jax
import jax.numpy as jnp
from jax.experimental import pallas as pl
from jax.experimental.pallas import tpu as pltpu


def _round_up(x, m):
    return (x + m - 1) // m * m


def _cdiv(a, b):
    return -(-a // b)


def _vmem_capacity_bytes():
    try:
        return int(pltpu.get_tpu_info().vmem_capacity_bytes)
    except Exception:
        return 64 << 20  # v7x per-TensorCore size: safe lower bound everywhere


def _vmem_limit(est_bytes, cap_bytes):
    # Request what the tiling needs (plus headroom), never more than physical.
    return int(min(cap_bytes, max(est_bytes * 5 // 4 + (4 << 20), 32 << 20)))


def _choose_tm(M, cap_rows, sub):
    """M-tile size: as large as the VMEM budget allows (<=1024 rows),
    sublane-aligned, >=2 tiles when worthwhile (v7x megacore), low padding."""
    m_min = _round_up(M, sub)
    tm = int(min(max(cap_rows, sub), 1024, m_min))
    tm = max(sub, tm // sub * sub)
    if tm >= m_min:
        if m_min >= 128:
            # One tile would hold all rows; split so both v7x TensorCores work.
            tm = _round_up(_cdiv(M, 2), sub)
        else:
            tm = m_min
    else:
        # Equalize tile sizes to minimize padded rows.
        n_tiles = _cdiv(m_min, tm)
        tm = max(sub, _round_up(_cdiv(M, n_tiles), sub))
    return tm


def _choose_tk(d_h, d_in, d_o, cbytes, budget):
    """Hidden-dim chunk for the streamed path: a 128-multiple divisor of d_h
    whose double-buffered W1/W2 chunks stay within half the VMEM budget."""
    if d_h % 128 != 0:
        return d_h
    for cand in (1024, 512, 256, 128):
        if d_h % cand == 0 and 2 * (d_in + d_o) * cand * cbytes <= budget // 2:
            return cand
    return 128


# --------------------------- kernels ---------------------------------------


def _ffn_resident_kernel(x_ref, w1_ref, b1_ref, w2_ref, b2_ref, o_ref):
    # One M tile per grid step; all weights resident in VMEM.  Chain both
    # matmuls in registers (no hidden-activation VMEM round-trip).
    h = jnp.dot(x_ref[...], w1_ref[...], preferred_element_type=jnp.float32)
    h = jnp.maximum(h + b1_ref[...], 0.0)                  # bias + ReLU (f32)
    y = jnp.dot(h.astype(w2_ref.dtype), w2_ref[...],
                preferred_element_type=jnp.float32)
    y = jnp.maximum(y + b2_ref[...], 0.0)                  # bias + ReLU (f32)
    o_ref[...] = y.astype(o_ref.dtype)


def _ffn_kstream_kernel(x_ref, w1_ref, b1_ref, w2_ref, b2_ref, o_ref, acc_ref):
    # grid = (M tiles, hidden-dim chunks).  Axis 1 MUST remain the innermost,
    # sequentially iterated ("arbitrary") axis: acc_ref carries partial sums
    # of the second matmul across it and o_ref is written only on its last
    # step.  x_ref: (tm, d_in); w1_ref: (d_in, tk); b1_ref: (1, tk) f32;
    # w2_ref: (tk, d_o); b2_ref: (1, d_o) f32; acc_ref: (tm, d_o) f32.
    k = pl.program_id(1)

    @pl.when(k == 0)
    def _():
        acc_ref[...] = jnp.zeros_like(acc_ref)

    h = jnp.dot(x_ref[...], w1_ref[...], preferred_element_type=jnp.float32)
    h = jnp.maximum(h + b1_ref[...], 0.0)                  # hidden chunk
    acc_ref[...] += jnp.dot(h.astype(w2_ref.dtype), w2_ref[...],
                            preferred_element_type=jnp.float32)

    @pl.when(k == pl.num_programs(1) - 1)
    def _():
        y = jnp.maximum(acc_ref[...] + b2_ref[...], 0.0)
        o_ref[...] = y.astype(o_ref.dtype)


# --------------------------- wrapper ----------------------------------------


@functools.partial(jax.jit, static_argnames=("tm", "tk", "compute_dtype",
                                             "out_dtype",
                                             "max_weight_resident_bytes"))
def feed_forward(x, w1, b1, w2, b2, *, tm=None, tk=None,
                 compute_dtype=jnp.bfloat16, out_dtype=None,
                 max_weight_resident_bytes=None):
    """Fused Linear->ReLU->Linear->ReLU.

    x: (batch, seq, d_in); w1: (d_in, d_h); w2: (d_h, d_o).
    Returns (batch, seq, d_o) in `out_dtype` (default: x.dtype; pass
    jnp.bfloat16 to halve the output HBM writeback when the consumer allows).
    `max_weight_resident_bytes=0` forces the hidden-streamed path.
    """
    batch, seq, d_in = x.shape
    d_h = w1.shape[1]
    d_o = w2.shape[1]
    assert w1.shape[0] == d_in and w2.shape[0] == d_h
    assert b1.shape[-1] == d_h and b2.shape[-1] == d_o
    out_dtype = jnp.dtype(x.dtype if out_dtype is None else out_dtype)
    M = batch * seq

    cbytes = jnp.dtype(compute_dtype).itemsize
    obytes = out_dtype.itemsize
    sub = 8 if cbytes >= 4 else (16 if cbytes == 2 else 32)  # sublane packing

    vmem_cap = _vmem_capacity_bytes()
    budget = vmem_cap * 3 // 4  # headroom for compiler scratch / semaphores

    # ---- path choice: fully-resident weights vs hidden-dim streaming ----
    w_res = (d_in * d_h + d_h * d_o) * cbytes + (d_h + d_o) * 4
    per_row_res = 2 * d_in * cbytes + 2 * d_o * obytes  # x + out, dbl-buffered
    min_rows = min(128, _round_up(M, sub))
    resident_fits = w_res + per_row_res * min_rows <= budget
    if max_weight_resident_bytes is not None:
        resident_fits = resident_fits and (w_res <= max_weight_resident_bytes)

    # ---- operands: bf16 (or f32) matmul inputs feed the MXU; f32 biases ----
    w1c = w1.astype(compute_dtype)
    w2c = w2.astype(compute_dtype)
    b1f = b1.reshape(1, d_h).astype(jnp.float32)
    b2f = b2.reshape(1, d_o).astype(jnp.float32)
    flops_per_row = 2 * d_in * d_h + 2 * d_h * d_o

    if resident_fits:
        # ---------------- resident-weights path ----------------
        if tm is None:
            tm_ = _choose_tm(M, (budget - w_res) // per_row_res, sub)
        else:
            tm_ = max(sub, min(_round_up(tm, sub), _round_up(M, sub)))
        m_pad = _round_up(M, tm_)
        m_tiles = m_pad // tm_

        xc = x.reshape(M, d_in).astype(compute_dtype)
        if m_pad != M:
            # Padded rows produce relu(b1)-derived garbage; sliced off below.
            xc = jnp.pad(xc, ((0, m_pad - M), (0, 0)))

        est_vmem = w_res + per_row_res * tm_
        cost = pl.CostEstimate(
            flops=flops_per_row * m_pad,
            transcendentals=0,
            bytes_accessed=int(m_pad * d_in * cbytes
                               + (d_in * d_h + d_h * d_o) * cbytes
                               + (d_h + d_o) * 4
                               + m_pad * d_o * obytes))

        out2d = pl.pallas_call(
            _ffn_resident_kernel,
            out_shape=jax.ShapeDtypeStruct((m_pad, d_o), out_dtype),
            grid_spec=pltpu.PrefetchScalarGridSpec(
                num_scalar_prefetch=0,
                grid=(m_tiles,),
                in_specs=[
                    pl.BlockSpec((tm_, d_in), lambda i: (i, 0)),     # x streams
                    # Constant-index operands: single-buffered (Buffered(1)),
                    # halving their VMEM cost vs. the default double buffer.
                    pl.BlockSpec((d_in, d_h), lambda i: (0, 0),
                                 pipeline_mode=pl.Buffered(1)),      # W1
                    pl.BlockSpec((1, d_h), lambda i: (0, 0),
                                 pipeline_mode=pl.Buffered(1)),      # b1
                    pl.BlockSpec((d_h, d_o), lambda i: (0, 0),
                                 pipeline_mode=pl.Buffered(1)),      # W2
                    pl.BlockSpec((1, d_o), lambda i: (0, 0),
                                 pipeline_mode=pl.Buffered(1)),      # b2
                ],
                out_specs=pl.BlockSpec((tm_, d_o), lambda i: (i, 0)),
            ),
            compiler_params=pltpu.CompilerParams(
                dimension_semantics=("parallel",),
                vmem_limit_bytes=_vmem_limit(est_vmem, vmem_cap),
            ),
            cost_estimate=cost,
        )(xc, w1c, b1f, w2c, b2f)
    else:
        # ------------- hidden-dim streamed path (large weights) -------------
        if tk is None:
            tk_ = _choose_tk(d_h, d_in, d_o, cbytes, budget)
        else:
            tk_ = tk
        assert d_h % tk_ == 0, "tk must divide the hidden width"
        k_tiles = d_h // tk_

        fixed = (2 * (d_in * tk_ + tk_ * d_o) * cbytes  # W1/W2 chunks, dbl-buf
                 + 2 * tk_ * 4 + d_o * 4)               # b1 chunks + b2
        per_row_ks = per_row_res + d_o * 4              # + f32 acc scratch
        if tm is None:
            tm_ = _choose_tm(M, max(sub, (budget - fixed) // per_row_ks), sub)
        else:
            tm_ = max(sub, min(_round_up(tm, sub), _round_up(M, sub)))
        m_pad = _round_up(M, tm_)
        m_tiles = m_pad // tm_

        xc = x.reshape(M, d_in).astype(compute_dtype)
        if m_pad != M:
            xc = jnp.pad(xc, ((0, m_pad - M), (0, 0)))

        est_vmem = fixed + per_row_ks * tm_
        cost = pl.CostEstimate(
            flops=flops_per_row * m_pad,
            transcendentals=0,
            bytes_accessed=int(m_pad * d_in * cbytes
                               + m_tiles * (d_in * d_h + d_h * d_o) * cbytes
                               + m_tiles * d_h * 4 + d_o * 4
                               + m_pad * d_o * obytes))

        out2d = pl.pallas_call(
            _ffn_kstream_kernel,
            out_shape=jax.ShapeDtypeStruct((m_pad, d_o), out_dtype),
            grid_spec=pltpu.PrefetchScalarGridSpec(
                num_scalar_prefetch=0,
                # Axis 1 (hidden chunks) must stay innermost + sequential:
                # acc_ref carries partial sums across it.
                grid=(m_tiles, k_tiles),
                in_specs=[
                    pl.BlockSpec((tm_, d_in), lambda i, k: (i, 0)),   # x
                    pl.BlockSpec((d_in, tk_), lambda i, k: (0, k)),   # W1 cols
                    pl.BlockSpec((1, tk_), lambda i, k: (0, k)),      # b1 chunk
                    pl.BlockSpec((tk_, d_o), lambda i, k: (k, 0)),    # W2 rows
                    pl.BlockSpec((1, d_o), lambda i, k: (0, 0),
                                 pipeline_mode=pl.Buffered(1)),       # b2
                ],
                out_specs=pl.BlockSpec((tm_, d_o), lambda i, k: (i, 0)),
                scratch_shapes=[pltpu.VMEM((tm_, d_o), jnp.float32)],
            ),
            compiler_params=pltpu.CompilerParams(
                dimension_semantics=("parallel", "arbitrary"),
                vmem_limit_bytes=_vmem_limit(est_vmem, vmem_cap),
            ),
            cost_estimate=cost,
        )(xc, w1c, b1f, w2c, b2f)

    return out2d[:M].reshape(batch, seq, d_o)


# --------------------------- reference / init --------------------------------


def init_params(key, d_in, d_out, dtype=jnp.float32):
    """nn.Linear-style init; weights stored transposed as (in, out)."""
    k1, k2, k3, k4 = jax.random.split(key, 4)
    s1 = 1.0 / jnp.sqrt(d_in)
    s2 = 1.0 / jnp.sqrt(d_out)
    w1 = jax.random.uniform(k1, (d_in, d_out), dtype, -s1, s1)
    b1 = jax.random.uniform(k2, (d_out,), dtype, -s1, s1)
    w2 = jax.random.uniform(k3, (d_out, d_out), dtype, -s2, s2)
    b2 = jax.random.uniform(k4, (d_out,), dtype, -s2, s2)
    return w1, b1, w2, b2


def _reference(x, w1, b1, w2, b2):
    h = jnp.maximum(x @ w1 + b1, 0.0)
    return jnp.maximum(h @ w2 + b2, 0.0)


if __name__ == "__main__":
    key = jax.random.PRNGKey(0)

    # --- small shapes matching the module spec ---
    batch, seq, d_in, d_out = 2, 8, 32, 32
    kx, kp, key = jax.random.split(key, 3)
    x = jax.random.normal(kx, (batch, seq, d_in), jnp.float32)
    w1, b1, w2, b2 = init_params(kp, d_in, d_out)
    ref = _reference(x, w1, b1, w2, b2)

    # Resident path, f32 compute: tight match with the reference.
    out_f32 = jax.block_until_ready(
        feed_forward(x, w1, b1, w2, b2, compute_dtype=jnp.float32))
    assert out_f32.shape == (batch, seq, d_out)
    assert jnp.allclose(out_f32, ref, atol=1e-5, rtol=1e-5)

    # Resident path, default bf16 compute (MXU-native, f32 accumulation).
    out_bf16 = jax.block_until_ready(feed_forward(x, w1, b1, w2, b2))
    assert out_bf16.shape == (batch, seq, d_out)
    assert jnp.allclose(out_bf16, ref, atol=5e-2, rtol=5e-2)

    # Hidden-streamed path (forced), f32 compute: tight match.
    out_ks = jax.block_until_ready(
        feed_forward(x, w1, b1, w2, b2, compute_dtype=jnp.float32,
                     max_weight_resident_bytes=0))
    assert jnp.allclose(out_ks, ref, atol=1e-5, rtol=1e-5)

    # --- larger shapes: M tiling + padding, and multi-chunk hidden streaming ---
    batch2, seq2, d_in2, d_out2 = 2, 500, 128, 256   # M = 1000 -> 2 tiles of 512
    kx2, kp2 = jax.random.split(key)
    x2 = jax.random.normal(kx2, (batch2, seq2, d_in2), jnp.float32)
    params2 = init_params(kp2, d_in2, d_out2)
    ref2 = _reference(x2, *params2)

    out2 = jax.block_until_ready(feed_forward(x2, *params2))
    assert out2.shape == (batch2, seq2, d_out2)
    assert jnp.allclose(out2, ref2, atol=7e-2, rtol=7e-2)

    out2_ks = jax.block_until_ready(
        feed_forward(x2, *params2, tk=128, max_weight_resident_bytes=0))
    assert out2_ks.shape == (batch2, seq2, d_out2)
    assert jnp.allclose(out2_ks, ref2, atol=7e-2, rtol=7e-2)

    print("KERNEL_OK")
</pallas_src>

<mosaic_0001>
module attributes {stable_mosaic.version = 11 : i64} {
  func.func @_ffn_resident_kernel(%arg0: i32, %arg1: memref<16x32xf32, #tpu.memory_space<vmem>>, %arg2: memref<32x32xf32, #tpu.memory_space<vmem>>, %arg3: memref<1x32xf32, #tpu.memory_space<vmem>>, %arg4: memref<32x32xf32, #tpu.memory_space<vmem>>, %arg5: memref<1x32xf32, #tpu.memory_space<vmem>>, %arg6: memref<16x32xf32, #tpu.memory_space<vmem>>) attributes {dimension_semantics = [#tpu.dimension_semantics<parallel>], iteration_bounds = array<i64: 1>, scalar_prefetch = 0 : i64, scratch_operands = 0 : i64, tpu.core_type = #tpu.core_type<tc>, window_params = [{transform_indices = @transform_0, window_bounds = array<i64: 16, 32>}, {pipeline_mode = #tpu.pipeline_mode<synchronous>, transform_indices = @transform_1, window_bounds = array<i64: 32, 32>}, {pipeline_mode = #tpu.pipeline_mode<synchronous>, transform_indices = @transform_2, window_bounds = array<i64: 1, 32>}, {pipeline_mode = #tpu.pipeline_mode<synchronous>, transform_indices = @transform_3, window_bounds = array<i64: 32, 32>}, {pipeline_mode = #tpu.pipeline_mode<synchronous>, transform_indices = @transform_4, window_bounds = array<i64: 1, 32>}, {transform_indices = @transform_5, window_bounds = array<i64: 16, 32>}]} {
    %c0 = arith.constant 0 : index
    %c0_0 = arith.constant 0 : index
    %0 = vector.load %arg1[%c0, %c0_0] : memref<16x32xf32, #tpu.memory_space<vmem>>, vector<16x32xf32>
    %c0_1 = arith.constant 0 : index
    %c0_2 = arith.constant 0 : index
    %1 = vector.load %arg2[%c0_1, %c0_2] : memref<32x32xf32, #tpu.memory_space<vmem>>, vector<32x32xf32>
    %cst = arith.constant dense<0.000000e+00> : vector<16x32xf32>
    %2 = tpu.matmul %0, %1, %cst {dimension_numbers = #tpu.dot_dimension_numbers<[1], [0], [0], [1], [0, 0, 1, 1], [], []>} : vector<16x32xf32>, vector<32x32xf32>, vector<16x32xf32> -> vector<16x32xf32>
    %c0_3 = arith.constant 0 : index
    %c0_4 = arith.constant 0 : index
    %3 = vector.load %arg3[%c0_3, %c0_4] : memref<1x32xf32, #tpu.memory_space<vmem>>, vector<1x32xf32>
    %4 = vector.broadcast %3 : vector<1x32xf32> to vector<16x32xf32>
    %5 = arith.addf %2, %4 : vector<16x32xf32>
    %cst_5 = arith.constant 0.000000e+00 : f32
    %6 = vector.broadcast %cst_5 : f32 to vector<16x32xf32>
    %7 = arith.maximumf %5, %6 : vector<16x32xf32>
    %c0_6 = arith.constant 0 : index
    %c0_7 = arith.constant 0 : index
    %8 = vector.load %arg4[%c0_6, %c0_7] : memref<32x32xf32, #tpu.memory_space<vmem>>, vector<32x32xf32>
    %cst_8 = arith.constant dense<0.000000e+00> : vector<16x32xf32>
    %9 = tpu.matmul %7, %8, %cst_8 {dimension_numbers = #tpu.dot_dimension_numbers<[1], [0], [0], [1], [0, 0, 1, 1], [], []>} : vector<16x32xf32>, vector<32x32xf32>, vector<16x32xf32> -> vector<16x32xf32>
    %c0_9 = arith.constant 0 : index
    %c0_10 = arith.constant 0 : index
    %10 = vector.load %arg5[%c0_9, %c0_10] : memref<1x32xf32, #tpu.memory_space<vmem>>, vector<1x32xf32>
    %11 = vector.broadcast %10 : vector<1x32xf32> to vector<16x32xf32>
    %12 = arith.addf %9, %11 : vector<16x32xf32>
    %cst_11 = arith.constant 0.000000e+00 : f32
    %13 = vector.broadcast %cst_11 : f32 to vector<16x32xf32>
    %14 = arith.maximumf %12, %13 : vector<16x32xf32>
    %c0_12 = arith.constant 0 : index
    %c0_13 = arith.constant 0 : index
    %15 = vector.load %arg6[%c0_12, %c0_13] : memref<16x32xf32, #tpu.memory_space<vmem>>, vector<16x32xf32>
    tpu.vector_store %arg6[%c0_12, %c0_13], %14 {strides = array<i32>} : memref<16x32xf32, #tpu.memory_space<vmem>>, vector<16x32xf32>,
    return
  }
  func.func @transform_0(%arg0: i32) -> (i32, i32) {
    %c0_i32 = arith.constant 0 : i32
    %c0_i32_0 = arith.constant 0 : i32
    return %arg0, %c0_i32 : i32, i32
  }
  func.func @transform_1(%arg0: i32) -> (i32, i32) {
    %c0_i32 = arith.constant 0 : i32
    %c0_i32_0 = arith.constant 0 : i32
    %c0_i32_1 = arith.constant 0 : i32
    return %c0_i32, %c0_i32_0 : i32, i32
  }
  func.func @transform_2(%arg0: i32) -> (i32, i32) {
    %c0_i32 = arith.constant 0 : i32
    %c0_i32_0 = arith.constant 0 : i32
    %c0_i32_1 = arith.constant 0 : i32
    return %c0_i32, %c0_i32_0 : i32, i32
  }
  func.func @transform_3(%arg0: i32) -> (i32, i32) {
    %c0_i32 = arith.constant 0 : i32
    %c0_i32_0 = arith.constant 0 : i32
    %c0_i32_1 = arith.constant 0 : i32
    return %c0_i32, %c0_i32_0 : i32, i32
  }
  func.func @transform_4(%arg0: i32) -> (i32, i32) {
    %c0_i32 = arith.constant 0 : i32
    %c0_i32_0 = arith.constant 0 : i32
    %c0_i32_1 = arith.constant 0 : i32
    return %c0_i32, %c0_i32_0 : i32, i32
  }
  func.func @transform_5(%arg0: i32) -> (i32, i32) {
    %c0_i32 = arith.constant 0 : i32
    %c0_i32_0 = arith.constant 0 : i32
    return %arg0, %c0_i32 : i32, i32
  }
}

</mosaic_0001>

<bundles_post_ra>
// kernel: feed_forward.1
= control target key start
LH: loop header
LB: loop body
LE: loop exit
PB: predicated region body
PF: predicated region fallthrough
CT: control target
= control target key end

     0   :  { %10 = vsyncpa [#allocation3], 0  ;;  %s544_s0 = inlined_call_operand.hbm [shape: f32[16,32], index: 0, kind: input, shape index: {}]   ;;  %s545_s1 = inlined_call_operand.hbm [shape: f32[32,32], index: 1, kind: input, shape index: {}]   ;;  %s546_s2 = inlined_call_operand.vmem [shape: f32[1,32], index: 2, kind: input, shape index: {}]   ;;  %s547_s3 = inlined_call_operand.hbm [shape: f32[32,32], index: 3, kind: input, shape index: {}]   ;;  %s548_s4 = inlined_call_operand.vmem [shape: f32[1,32], index: 4, kind: input, shape index: {}]   ;;  %s549_s5 = inlined_call_operand.hbm [shape: f32[16,32], index: 5, kind: output, shape index: {}]  }
   0x1   :  { %11 = vsyncpa [#allocation6], 0 }
   0x2   :  { %12 = vsyncpa [#allocation4], 0  ;;  %s429_s18 = smov [#allocation5]   ;;  %s430_s20 = smov [#allocation2]  }
   0x3   :  { %s30_s19 = sshll.u32 %s429_s18, 4  ;;  %s18_s21 = sshll.u32 %s430_s20, 4  ;;  %s31_s19 = int_to_ptr.vmem [resolvable:$true] %s30_s19  ;;  %s465_s21 = int_to_ptr.vmem [resolvable:$true] %s18_s21 }
   0x4   :  { %s335_s24 = scalar_lea.hbm %s545_s1, 512 }
   0x5   :  { %p336_p0 = scmp.ne.s32.totalorder %s545_s1, %s335_s24  ;;  %p339_p1 = scmp.lt.u32.totalorder %s335_s24, %s545_s1 }
   0x7   :  { %p341_p2 = pnand %p339_p1, %p336_p0 }
   0x9   :  { %344 = shalt.err (!%p341_p2)
}
   0xa   :  { %s345_s29 = scalar_lea.vmem %s31_s19, 512  ;;  %p350_p4 = scmp.lt.s32.totalorder %s31_s19, %s31_s19 }
   0xb   :  { %p346_p3 = scmp.ne.s32.totalorder %s31_s19, %s345_s29  ;;  %p351_p5 = scmp.lt.s32.totalorder %s345_s29, %s345_s29 }
   0xd   :  { %p352_p6 = por %p351_p5, %p350_p4 }
   0xf   :  { %p353_p7 = pnand %p352_p6, %p346_p3 }
  0x11   :  { %356 = shalt.err (!%p353_p7)
}
  0x12   :  { %s431_s30 = smov 128   ;;  %s432_s6 = smov 8  }
  0x13   :  { %36 = dma.hbm_to_vmem [thread:$0]  %s545_s1, 512, %s31_s19, [#allocation6], %s431_s30, %s431_s30, %s432_s6  }
  0x14   :  { %s357_s11 = scalar_lea.hbm %s544_s0, 256 }
  0x15   :  { %p358_p8 = scmp.ne.s32.totalorder %s544_s0, %s357_s11  ;;  %p361_p9 = scmp.lt.u32.totalorder %s357_s11, %s544_s0 }
  0x17   :  { %p363_p10 = pnand %p361_p9, %p358_p8 }
  0x19   :  { %366 = shalt.err (!%p363_p10)
}
  0x1a   :  { %s367_s16 = scalar_lea.vmem %s465_s21, 256  ;;  %p372_p12 = scmp.lt.s32.totalorder %s465_s21, %s465_s21 }
  0x1b   :  { %p368_p11 = scmp.ne.s32.totalorder %s465_s21, %s367_s16  ;;  %p373_p13 = scmp.lt.s32.totalorder %s367_s16, %s367_s16 }
  0x1d   :  { %p374_p0 = por %p373_p13, %p372_p12 }
  0x1f   :  { %p375_p1 = pnand %p374_p0, %p368_p11 }
  0x21   :  { %378 = shalt.err (!%p375_p1)
}
  0x22   :  { %24 = dma.hbm_to_vmem [thread:$0]  %s544_s0, 256, %s465_s21, [#allocation3], %s431_s30, %s431_s30, %s432_s6  }
  0x23   :  { %s433_s18 = smov [#allocation7]   ;;  %s379_s23 = scalar_lea.hbm %s547_s3, 512 }
  0x24   :  { %s44_s19 = sshll.u32 %s433_s18, 4  ;;  %p380_p2 = scmp.ne.s32.totalorder %s547_s3, %s379_s23  ;;  %s45_s19 = int_to_ptr.vmem [resolvable:$true] %s44_s19 }
  0x25   :  { %p383_p3 = scmp.lt.u32.totalorder %s379_s23, %s547_s3 }
  0x27   :  { %p385_p4 = pnand %p383_p3, %p380_p2 }
  0x29   :  { %388 = shalt.err (!%p385_p4)
}
  0x2a   :  { %s389_s28 = scalar_lea.vmem %s45_s19, 512  ;;  %p394_p6 = scmp.lt.s32.totalorder %s45_s19, %s45_s19 }
  0x2b   :  { %p390_p5 = scmp.ne.s32.totalorder %s45_s19, %s389_s28  ;;  %p395_p7 = scmp.lt.s32.totalorder %s389_s28, %s389_s28 }
  0x2d   :  { %p396_p8 = por %p395_p7, %p394_p6 }
  0x2f   :  { %p397_p9 = pnand %p396_p8, %p390_p5 }
  0x31   :  { %400 = shalt.err (!%p397_p9)
}
  0x32   :  { %50 = dma.hbm_to_vmem [thread:$0]  %s547_s3, 512, %s45_s19, [#allocation6], %s431_s30, %s431_s30, %s432_s6  }
  0x33   :  { %423 = dma.done.wait [#allocation3], 256  }
  0x34   :  { %424 = vsyncadd [#allocation3], 4294967040 }
  0x35   :  { %425 = dma.done.wait [#allocation6], 1024  }
  0x36   :  { %426 = vsyncadd [#allocation6], 4294966272  ;;  %vm75_vm0 = vcmask 261120   ;;  %v64_v0 = vld [vmem:[#allocation5] sm:$0xff]  ;;  %v65_v1 = vld [vmem:[#allocation5 + $0x8] sm:$0xff]  ;;  %s434_s9 = smov [#allocation8]  }
  0x37   :  { %v66_v2 = vld [vmem:[#allocation5 + $0x10] sm:$0xff]  ;;  %v313_v3 = vpack.c.bf16 %v65_v1, %v64_v0  ;;  %v67_v4 = vld [vmem:[#allocation5 + $0x18] sm:$0xff]  ;;  %v159_v7 = vld [vmem:[#allocation7] sm:$0xff]  ;;  %s260_s10 = sshll.u32 %s434_s9, 4  ;;  %s261_s10 = int_to_ptr.vmem [resolvable:$true] %s260_s10 }
  0x38   :  { %v62_v5 = vld [vmem:[#allocation2] sm:$0xff]  ;;  %v317_v6 = vpack.c.bf16 %v67_v4, %v66_v2  ;;  %v160_v8 = vld [vmem:[#allocation7 + $0x8] sm:$0xff]  ;;  %v63_v10 = vld [vmem:[#allocation2 + $0x8] sm:$0xff]  ;;  %p406_p11 = scmp.lt.s32.totalorder %s261_s10, %s261_s10 }
  0x39   :  { %299 = vmatprep.mubr.msk.f32.mxu0 %vm75_vm0, %v62_v5  ;;  %314 = vmatprep.subr.bf16.mxu0 %v313_v3  ;;  %v321_v9 = vpack.c.bf16 %v160_v8, %v159_v7  ;;  %v161_v11 = vld [vmem:[#allocation7 + $0x10] sm:$0xff]  ;;  %v162_v12 = vld [vmem:[#allocation7 + $0x18] sm:$0xff] }
  0x3a   :  { %316 = vmatpush3.bf16.msra.mxu0 %v313_v3  ;;  %v325_v13 = vpack.c.bf16 %v162_v12, %v161_v11  ;;  %v273_v14 = vld [vmem:[%s546_s2] ss:$0 sm:$0xff]  ;;  %s401_s2 = scalar_lea.vmem %s261_s10, 256 }
  0x3b   :  { %318 = vmatprep.subr.bf16.mxu0 %v317_v6  ;;  %322 = vmatprep.subr.bf16.mxu1 %v321_v9  ;;  %v276_v21 = vld [vmem:[%s548_s4] ss:$0 sm:$0xff]  ;;  %p402_p10 = scmp.ne.s32.totalorder %s261_s10, %s401_s2  ;;  %p407_p12 = scmp.lt.s32.totalorder %s401_s2, %s401_s2 }
  0x3c   :  { %324 = vmatpush3.bf16.msra.mxu1 %v321_v9 }
  0x3d   :  { %326 = vmatprep.subr.bf16.mxu1 %v325_v13  ;;  %p408_p13 = por %p407_p12, %p406_p11 }
  0x3e   :  { %320 = vmatpush3.bf16.msra.mxu0 %v317_v6 }
  0x3f   :  { %p409_p0 = pnand %p408_p13, %p402_p10 }
  0x40   :  { %328 = vmatpush3.bf16.msra.mxu1 %v325_v13 }
  0x41   :  { %300 = vmatmul.mubr.msk.f32.vlgmr.msra.gmra.mrb[0].mxu0 %vm75_vm0, %v63_v10 }
 0x114   :  { %v301_v15 = vpop.f32.mrb[0].mxu0 }
 0x115   :  { %v154_v16 = vadd.f32 %v301_v15, %v273_v14  ;;  %v148_v17 = vpop.f32.mrb[1].mxu0 }
 0x116   :  { %v149_v18 = vadd.f32 %v273_v14, %v148_v17 }
 0x117   :  { %v158_v20 = vmax.f32 %v154_v16, 0.0 }
 0x118   :  { %v157_v19 = vmax.f32 %v149_v18, 0.0 }
 0x11a   :  { %310 = vmatprep.mubr.msk.f32.mxu1 %vm75_vm0, %v157_v19 }
 0x11b   :  { %311 = vmatmul.mubr.msk.f32.vlgmr.msra.gmra.mrb[0].mxu1 %vm75_vm0, %v158_v20 }
 0x1ee   :  { %v312_v22 = vpop.f32.mrb[0].mxu1 }
 0x1ef   :  { %v248_v23 = vadd.f32 %v312_v22, %v276_v21  ;;  %v242_v24 = vpop.f32.mrb[1].mxu1 }
 0x1f0   :  { %v243_v25 = vadd.f32 %v276_v21, %v242_v24 }
 0x1f1   :  { %v252_v26 = vmax.f32 %v248_v23, 0.0 }
 0x1f2   :  { %v251_v27 = vmax.f32 %v243_v25, 0.0 }
 0x1f3   :  { %254 = vst.msk [vmem:[#allocation8 + $0x8] sm:$0xff] %vm75_vm0, %v252_v26 }
 0x1f4   :  { %253 = vst.msk [vmem:[#allocation8] sm:$0xff] %vm75_vm0, %v251_v27 }
 0x1f5   :  { %412 = shalt.err (!%p409_p0)
}
 0x1f6   :  { %s413_s12 = scalar_lea.hbm %s549_s5, 256 }
 0x1f7   :  { %p414_p1 = scmp.ne.s32.totalorder %s549_s5, %s413_s12  ;;  %p417_p2 = scmp.lt.u32.totalorder %s413_s12, %s549_s5 }
 0x1f9   :  { %p419_p3 = pnand %p417_p2, %p414_p1 }
 0x1fb   :  { %422 = shalt.err (!%p419_p3)
}
 0x1fc   :  { %266 = dma.vmem_to_hbm [thread:$0]  %s261_s10, 256, %s549_s5, [#allocation4], %s431_s30, %s431_s30, %s432_s6  }
 0x1fd   :  { %427 = dma.done.wait [#allocation4], 256  }
 0x1fe   :  { %428 = vsyncadd [#allocation4], 4294967040 }
 0x1ff   :  { %270 = vsyncpa [#allocation3], 1 }
 0x200   :  { %271 = vsyncpa [#allocation6], 1 }
 0x201   :  { %272 = vsyncpa [#allocation4], 1 }

</bundles_post_ra>
